<compile_context>
chip_gen: v7x
topology: tpu7x:2x2x1
jax: 0.10.0
libtpu: 0.0.40
codegen_flags: <defaults>
</compile_context>

<pallas_src>
import functools

import jax
import jax.numpy as jnp
import numpy as np
from jax import lax
from jax.experimental import pallas as pl
from jax.experimental.pallas import tpu as pltpu


def _round_up(n, m):
    return ((n + m - 1) // m) * m


def bilstm_fc_kernel(x_ref, w_ih_ref, w_hh_ref, b_ref, w_fc_ref, b_fc_ref,
                     out_ref, xg_ref, *, seq_len, batch_blk):
    hidden = w_hh_ref.shape[0]
    g4 = 4 * hidden

    # ---- Hoisted input projection for BOTH directions at once:
    #      (T*bb, I) @ (I, 8H) bf16 MXU matmul, f32 accumulation, biases folded.
    proj = (jnp.dot(x_ref[...], w_ih_ref[...],
                    preferred_element_type=jnp.float32) + b_ref[...])  # (T*bb, 8H)

    # Forward-direction gate slab parked in VMEM scratch (f32); the recurrence
    # then only carries h @ w_hh on its serial path.
    xg_ref[...] = proj[:, :g4]

    # Backward direction at the last kept timestep only: one reverse-cell step
    # on x[T-1] from the zero state (h0 == 0 => no w_hh_b term at all).
    gates_b = proj[(seq_len - 1) * batch_blk:, g4:]                    # (bb, 4H)

    w_hh = w_hh_ref[...]                                               # (H, 4H) bf16

    def step(t, carry):
        h, c = carry
        row = pl.multiple_of(t * batch_blk, 8)
        gates = (xg_ref[pl.ds(row, batch_blk), :]
                 + jnp.dot(h.astype(jnp.bfloat16), w_hh,
                           preferred_element_type=jnp.float32))        # (bb, 4H)
        # Whole-vreg activations; slice only the already-activated values.
        # PyTorch gate order along the 4H axis: i, f, g, o.
        sig = jax.nn.sigmoid(gates)
        tg = jnp.tanh(gates)
        c_new = (sig[:, hidden:2 * hidden] * c
                 + sig[:, :hidden] * tg[:, 2 * hidden:3 * hidden])
        h_new = sig[:, 3 * hidden:] * jnp.tanh(c_new)
        return (h_new, c_new)

    zeros = jnp.zeros((batch_blk, hidden), jnp.float32)
    h_f, _ = lax.fori_loop(0, seq_len, step, (zeros, zeros),
                           unroll=min(int(seq_len), 8))

    sig_b = jax.nn.sigmoid(gates_b)
    tg_b = jnp.tanh(gates_b)
    c_b = sig_b[:, :hidden] * tg_b[:, 2 * hidden:3 * hidden]           # f_b * c0 == 0
    h_b = sig_b[:, 3 * hidden:] * jnp.tanh(c_b)

    # ---- Lane-dense (128-wide, zero-padded) split-FC head: no h concat,
    #      unmasked full-lane store to the output tile.
    w_fc = w_fc_ref[...]                                               # (2H, 128) bf16
    out_ref[...] = (jnp.dot(h_f.astype(jnp.bfloat16), w_fc[:hidden],
                            preferred_element_type=jnp.float32)
                    + jnp.dot(h_b.astype(jnp.bfloat16), w_fc[hidden:],
                              preferred_element_type=jnp.float32)
                    + b_fc_ref[...])


def my_lstm_forward(x_bsf, kp):
    """x_bsf: (batch, seq, input_size) float32 -> (batch, output_size) float32."""
    batch, seq_len, in_size = x_bsf.shape
    hidden = kp["hidden"]
    out_size = kp["out_size"]
    out_pad = kp["w_fc_all"].shape[1]

    # Fill at least a full f32 sublane group per MXU push; cap the per-core
    # batch block at 128 rows so larger batches split across the grid.
    bb = min(_round_up(batch, 8), 128)
    b_pad = _round_up(batch, bb)
    nb = b_pad // bb

    # Cast BEFORE the transpose (halves its bytes), then time-major, pad batch,
    # and group batch blocks so each grid step gets a contiguous (T*bb, I) slab.
    x_bf = x_bsf.astype(jnp.bfloat16)
    x_tm = jnp.transpose(x_bf, (1, 0, 2))                       # (T, B, I)
    if b_pad != batch:
        x_tm = jnp.pad(x_tm, ((0, 0), (0, b_pad - batch), (0, 0)))
    x_blk = (x_tm.reshape(seq_len, nb, bb, in_size)
             .transpose(1, 0, 2, 3)
             .reshape(nb, seq_len * bb, in_size))               # (nb, T*bb, I)

    kernel = functools.partial(bilstm_fc_kernel, seq_len=seq_len, batch_blk=bb)
    out_padded = pl.pallas_call(
        kernel,
        out_shape=jax.ShapeDtypeStruct((b_pad, out_pad), jnp.float32),
        grid_spec=pltpu.PrefetchScalarGridSpec(
            num_scalar_prefetch=0,
            grid=(nb,),
            in_specs=[
                pl.BlockSpec((None, seq_len * bb, in_size), lambda b: (b, 0, 0)),
                pl.BlockSpec((in_size, 8 * hidden), lambda b: (0, 0)),
                pl.BlockSpec((hidden, 4 * hidden), lambda b: (0, 0)),
                pl.BlockSpec((1, 8 * hidden), lambda b: (0, 0)),
                pl.BlockSpec((2 * hidden, out_pad), lambda b: (0, 0)),
                pl.BlockSpec((1, out_pad), lambda b: (0, 0)),
            ],
            out_specs=pl.BlockSpec((bb, out_pad), lambda b: (b, 0)),
            scratch_shapes=[pltpu.VMEM((seq_len * bb, 4 * hidden), jnp.float32)],
        ),
        compiler_params=pltpu.CompilerParams(
            dimension_semantics=("parallel",)),
    )(x_blk, kp["w_ih_all"], kp["w_hh_f"], kp["b_all"],
      kp["w_fc_all"], kp["b_fc_pad"])
    return out_padded[:batch, :out_size]


# -------------------- parameter construction / reference --------------------

def init_params(key, input_size, hidden, output_size):
    """Raw PyTorch-shaped params (gate order i, f, g, o), float32."""
    k = 1.0 / np.sqrt(hidden)
    kf = 1.0 / np.sqrt(2 * hidden)
    keys = jax.random.split(key, 10)
    u = lambda kk, shape, lim: jax.random.uniform(kk, shape, jnp.float32, -lim, lim)
    return {
        "w_ih_f": u(keys[0], (4 * hidden, input_size), k),
        "w_hh_f": u(keys[1], (4 * hidden, hidden), k),
        "b_ih_f": u(keys[2], (4 * hidden,), k),
        "b_hh_f": u(keys[3], (4 * hidden,), k),
        "w_ih_b": u(keys[4], (4 * hidden, input_size), k),
        "w_hh_b": u(keys[5], (4 * hidden, hidden), k),
        "b_ih_b": u(keys[6], (4 * hidden,), k),
        "b_hh_b": u(keys[7], (4 * hidden,), k),
        "w_fc": u(keys[8], (output_size, 2 * hidden), kf),
        "b_fc": u(keys[9], (output_size,), kf),
    }


def prepare_kernel_params(raw, hidden, out_pad=128):
    """Kernel-ready params: stacked fwd/bwd input weights (I, 8H), combined
    biases (1, 8H), transposed recurrence weight, stacked+lane-padded FC head.
    bf16 MXU operands, f32 biases.  w_hh_b intentionally dropped (see note)."""
    out_size = int(raw["b_fc"].shape[0])
    assert out_size <= out_pad
    w_ih_all = jnp.concatenate([raw["w_ih_f"].T, raw["w_ih_b"].T],
                               axis=1).astype(jnp.bfloat16)            # (I, 8H)
    b_all = jnp.concatenate([raw["b_ih_f"] + raw["b_hh_f"],
                             raw["b_ih_b"] + raw["b_hh_b"]])[None, :] \
        .astype(jnp.float32)                                           # (1, 8H)
    w_hh_f = raw["w_hh_f"].T.astype(jnp.bfloat16)                      # (H, 4H)
    w_fc_t = raw["w_fc"].T                                             # (2H, out)
    w_fc_all = jnp.zeros((2 * hidden, out_pad), jnp.float32) \
        .at[:, :out_size].set(w_fc_t).astype(jnp.bfloat16)             # (2H, 128)
    b_fc_pad = jnp.zeros((1, out_pad), jnp.float32) \
        .at[0, :out_size].set(raw["b_fc"])                             # (1, 128)
    return {"w_ih_all": w_ih_all, "w_hh_f": w_hh_f, "b_all": b_all,
            "w_fc_all": w_fc_all, "b_fc_pad": b_fc_pad,
            "hidden": hidden, "out_size": out_size}


def ref_forward(x_bsf, raw, hidden):
    """Pure-JAX f32 reference faithful to the module: full bidirectional LSTM,
    take out[:, -1, :], fc."""
    x_tm = jnp.transpose(x_bsf, (1, 0, 2)).astype(jnp.float32)  # (T, B, I)
    batch = x_tm.shape[1]

    def make_step(w_ih, w_hh, b):
        w_ih_t, w_hh_t = w_ih.T, w_hh.T

        def step(carry, x_t):
            h, c = carry
            gates = x_t @ w_ih_t + h @ w_hh_t + b
            i = jax.nn.sigmoid(gates[:, 0 * hidden:1 * hidden])
            f = jax.nn.sigmoid(gates[:, 1 * hidden:2 * hidden])
            g = jnp.tanh(gates[:, 2 * hidden:3 * hidden])
            o = jax.nn.sigmoid(gates[:, 3 * hidden:4 * hidden])
            c = f * c + i * g
            h = o * jnp.tanh(c)
            return (h, c), h
        return step

    init = (jnp.zeros((batch, hidden), jnp.float32),
            jnp.zeros((batch, hidden), jnp.float32))
    _, h_f_seq = lax.scan(
        make_step(raw["w_ih_f"], raw["w_hh_f"], raw["b_ih_f"] + raw["b_hh_f"]),
        init, x_tm)
    _, h_b_seq_rev = lax.scan(
        make_step(raw["w_ih_b"], raw["w_hh_b"], raw["b_ih_b"] + raw["b_hh_b"]),
        init, x_tm[::-1])
    h_b_seq = h_b_seq_rev[::-1]
    last = jnp.concatenate([h_f_seq[-1], h_b_seq[-1]], axis=-1)  # == out[:, -1, :]
    return last @ raw["w_fc"].T + raw["b_fc"]


if __name__ == "__main__":
    batch, seq, input_size, hidden, output_size = 2, 8, 16, 32, 2
    key = jax.random.PRNGKey(0)
    kx, kparm = jax.random.split(key)
    x = jax.random.normal(kx, (batch, seq, input_size), jnp.float32)

    raw = init_params(kparm, input_size, hidden, output_size)
    kernel_params = prepare_kernel_params(raw, hidden)

    y = my_lstm_forward(x, kernel_params)
    jax.block_until_ready(y)
    assert y.shape == (batch, output_size)

    y_ref = ref_forward(x, raw, hidden)
    # bf16 MXU operands in the kernel -> ~1e-2-scale deviation vs the pure-f32
    # reference; tolerance sized accordingly (real bugs show up at O(0.1+)).
    np.testing.assert_allclose(np.asarray(y), np.asarray(y_ref),
                               rtol=3e-2, atol=3e-2)
    print("KERNEL_OK")
</pallas_src>

<mosaic_0001>
module attributes {stable_mosaic.version = 11 : i64} {
  func.func @bilstm_fc_kernel(%arg0: i32, %arg1: memref<1x64x16xbf16, #tpu.memory_space<vmem>>, %arg2: memref<16x256xbf16, #tpu.memory_space<vmem>>, %arg3: memref<32x128xbf16, #tpu.memory_space<vmem>>, %arg4: memref<1x256xf32, #tpu.memory_space<vmem>>, %arg5: memref<64x128xbf16, #tpu.memory_space<vmem>>, %arg6: memref<1x128xf32, #tpu.memory_space<vmem>>, %arg7: memref<8x128xf32, #tpu.memory_space<vmem>>, %arg8: memref<64x128xf32, #tpu.memory_space<vmem>>) attributes {dimension_semantics = [#tpu.dimension_semantics<parallel>], iteration_bounds = array<i64: 1>, scalar_prefetch = 0 : i64, scratch_operands = 1 : i64, tpu.core_type = #tpu.core_type<tc>, window_params = [{transform_indices = @transform_0, window_bounds = array<i64: 1, 64, 16>}, {pipeline_mode = #tpu.pipeline_mode<synchronous>, transform_indices = @transform_1, window_bounds = array<i64: 16, 256>}, {pipeline_mode = #tpu.pipeline_mode<synchronous>, transform_indices = @transform_2, window_bounds = array<i64: 32, 128>}, {pipeline_mode = #tpu.pipeline_mode<synchronous>, transform_indices = @transform_3, window_bounds = array<i64: 1, 256>}, {pipeline_mode = #tpu.pipeline_mode<synchronous>, transform_indices = @transform_4, window_bounds = array<i64: 64, 128>}, {pipeline_mode = #tpu.pipeline_mode<synchronous>, transform_indices = @transform_5, window_bounds = array<i64: 1, 128>}, {transform_indices = @transform_6, window_bounds = array<i64: 8, 128>}]} {
    %c0 = arith.constant 0 : index
    %c0_0 = arith.constant 0 : index
    %c0_1 = arith.constant 0 : index
    %0 = vector.load %arg1[%c0, %c0_0, %c0_1] : memref<1x64x16xbf16, #tpu.memory_space<vmem>>, vector<1x64x16xbf16>
    %1 = vector.shape_cast %0 : vector<1x64x16xbf16> to vector<64x16xbf16>
    %c0_2 = arith.constant 0 : index
    %c0_3 = arith.constant 0 : index
    %2 = vector.load %arg2[%c0_2, %c0_3] : memref<16x256xbf16, #tpu.memory_space<vmem>>, vector<16x256xbf16>
    %cst = arith.constant dense<0.000000e+00> : vector<64x256xf32>
    %3 = tpu.matmul %1, %2, %cst {dimension_numbers = #tpu.dot_dimension_numbers<[1], [0], [0], [1], [0, 0, 1, 1], [], []>} : vector<64x16xbf16>, vector<16x256xbf16>, vector<64x256xf32> -> vector<64x256xf32>
    %c0_4 = arith.constant 0 : index
    %c0_5 = arith.constant 0 : index
    %4 = vector.load %arg4[%c0_4, %c0_5] : memref<1x256xf32, #tpu.memory_space<vmem>>, vector<1x256xf32>
    %5 = vector.broadcast %4 : vector<1x256xf32> to vector<64x256xf32>
    %6 = arith.addf %3, %5 : vector<64x256xf32>
    %7 = vector.extract_strided_slice %6 {offsets = [0, 0], sizes = [64, 128], strides = [1, 1]} : vector<64x256xf32> to vector<64x128xf32>
    %c0_6 = arith.constant 0 : index
    %c0_7 = arith.constant 0 : index
    %8 = vector.load %arg8[%c0_6, %c0_7] : memref<64x128xf32, #tpu.memory_space<vmem>>, vector<64x128xf32>
    tpu.vector_store %arg8[%c0_6, %c0_7], %7 {strides = array<i32>} : memref<64x128xf32, #tpu.memory_space<vmem>>, vector<64x128xf32>,
    %9 = vector.extract_strided_slice %6 {offsets = [56, 128], sizes = [8, 128], strides = [1, 1]} : vector<64x256xf32> to vector<8x128xf32>
    %c0_8 = arith.constant 0 : index
    %c0_9 = arith.constant 0 : index
    %10 = vector.load %arg3[%c0_8, %c0_9] : memref<32x128xbf16, #tpu.memory_space<vmem>>, vector<32x128xbf16>
    %cst_10 = arith.constant 0.000000e+00 : f32
    %11 = vector.broadcast %cst_10 : f32 to vector<8x32xf32>
    %c0_i32 = arith.constant 0 : i32
    %c8_i32 = arith.constant 8 : i32
    %12 = arith.muli %c0_i32, %c8_i32 : i32
    %13 = tpu.assume_multiple %12, 8 : i32
    %14 = arith.index_cast %13 : i32 to index
    %c0_11 = arith.constant 0 : index
    %15 = vector.load %arg8[%14, %c0_11] : memref<64x128xf32, #tpu.memory_space<vmem>>, vector<8x128xf32>
    %16 = arith.truncf %11 : vector<8x32xf32> to vector<8x32xbf16>
    %cst_12 = arith.constant dense<0.000000e+00> : vector<8x128xf32>
    %17 = tpu.matmul %16, %10, %cst_12 {dimension_numbers = #tpu.dot_dimension_numbers<[1], [0], [0], [1], [0, 0, 1, 1], [], []>} : vector<8x32xbf16>, vector<32x128xbf16>, vector<8x128xf32> -> vector<8x128xf32>
    %18 = arith.addf %15, %17 : vector<8x128xf32>
    %19 = arith.negf %18 : vector<8x128xf32>
    %20 = math.exp %19 : vector<8x128xf32>
    %cst_13 = arith.constant 1.000000e+00 : f32
    %21 = vector.broadcast %cst_13 : f32 to vector<8x128xf32>
    %22 = arith.addf %21, %20 : vector<8x128xf32>
    %23 = arith.divf %21, %22 : vector<8x128xf32>
    %24 = math.tanh %18 : vector<8x128xf32>
    %25 = vector.extract_strided_slice %23 {offsets = [0, 32], sizes = [8, 32], strides = [1, 1]} : vector<8x128xf32> to vector<8x32xf32>
    %26 = arith.mulf %25, %11 : vector<8x32xf32>
    %27 = vector.extract_strided_slice %23 {offsets = [0, 0], sizes = [8, 32], strides = [1, 1]} : vector<8x128xf32> to vector<8x32xf32>
    %28 = vector.extract_strided_slice %24 {offsets = [0, 64], sizes = [8, 32], strides = [1, 1]} : vector<8x128xf32> to vector<8x32xf32>
    %29 = arith.mulf %27, %28 : vector<8x32xf32>
    %30 = arith.addf %26, %29 : vector<8x32xf32>
    %31 = vector.extract_strided_slice %23 {offsets = [0, 96], sizes = [8, 32], strides = [1, 1]} : vector<8x128xf32> to vector<8x32xf32>
    %32 = math.tanh %30 : vector<8x32xf32>
    %33 = arith.mulf %31, %32 : vector<8x32xf32>
    %c1_i32 = arith.constant 1 : i32
    %c8_i32_14 = arith.constant 8 : i32
    %34 = arith.muli %c1_i32, %c8_i32_14 : i32
    %35 = tpu.assume_multiple %34, 8 : i32
    %36 = arith.index_cast %35 : i32 to index
    %c0_15 = arith.constant 0 : index
    %37 = vector.load %arg8[%36, %c0_15] : memref<64x128xf32, #tpu.memory_space<vmem>>, vector<8x128xf32>
    %38 = arith.truncf %33 : vector<8x32xf32> to vector<8x32xbf16>
    %cst_16 = arith.constant dense<0.000000e+00> : vector<8x128xf32>
    %39 = tpu.matmul %38, %10, %cst_16 {dimension_numbers = #tpu.dot_dimension_numbers<[1], [0], [0], [1], [0, 0, 1, 1], [], []>} : vector<8x32xbf16>, vector<32x128xbf16>, vector<8x128xf32> -> vector<8x128xf32>
    %40 = arith.addf %37, %39 : vector<8x128xf32>
    %41 = arith.negf %40 : vector<8x128xf32>
    %42 = math.exp %41 : vector<8x128xf32>
    %cst_17 = arith.constant 1.000000e+00 : f32
    %43 = vector.broadcast %cst_17 : f32 to vector<8x128xf32>
    %44 = arith.addf %43, %42 : vector<8x128xf32>
    %45 = arith.divf %43, %44 : vector<8x128xf32>
    %46 = math.tanh %40 : vector<8x128xf32>
    %47 = vector.extract_strided_slice %45 {offsets = [0, 32], sizes = [8, 32], strides = [1, 1]} : vector<8x128xf32> to vector<8x32xf32>
    %48 = arith.mulf %47, %30 : vector<8x32xf32>
    %49 = vector.extract_strided_slice %45 {offsets = [0, 0], sizes = [8, 32], strides = [1, 1]} : vector<8x128xf32> to vector<8x32xf32>
    %50 = vector.extract_strided_slice %46 {offsets = [0, 64], sizes = [8, 32], strides = [1, 1]} : vector<8x128xf32> to vector<8x32xf32>
    %51 = arith.mulf %49, %50 : vector<8x32xf32>
    %52 = arith.addf %48, %51 : vector<8x32xf32>
    %53 = vector.extract_strided_slice %45 {offsets = [0, 96], sizes = [8, 32], strides = [1, 1]} : vector<8x128xf32> to vector<8x32xf32>
    %54 = math.tanh %52 : vector<8x32xf32>
    %55 = arith.mulf %53, %54 : vector<8x32xf32>
    %c2_i32 = arith.constant 2 : i32
    %c8_i32_18 = arith.constant 8 : i32
    %56 = arith.muli %c2_i32, %c8_i32_18 : i32
    %57 = tpu.assume_multiple %56, 8 : i32
    %58 = arith.index_cast %57 : i32 to index
    %c0_19 = arith.constant 0 : index
    %59 = vector.load %arg8[%58, %c0_19] : memref<64x128xf32, #tpu.memory_space<vmem>>, vector<8x128xf32>
    %60 = arith.truncf %55 : vector<8x32xf32> to vector<8x32xbf16>
    %cst_20 = arith.constant dense<0.000000e+00> : vector<8x128xf32>
    %61 = tpu.matmul %60, %10, %cst_20 {dimension_numbers = #tpu.dot_dimension_numbers<[1], [0], [0], [1], [0, 0, 1, 1], [], []>} : vector<8x32xbf16>, vector<32x128xbf16>, vector<8x128xf32> -> vector<8x128xf32>
    %62 = arith.addf %59, %61 : vector<8x128xf32>
    %63 = arith.negf %62 : vector<8x128xf32>
    %64 = math.exp %63 : vector<8x128xf32>
    %cst_21 = arith.constant 1.000000e+00 : f32
    %65 = vector.broadcast %cst_21 : f32 to vector<8x128xf32>
    %66 = arith.addf %65, %64 : vector<8x128xf32>
    %67 = arith.divf %65, %66 : vector<8x128xf32>
    %68 = math.tanh %62 : vector<8x128xf32>
    %69 = vector.extract_strided_slice %67 {offsets = [0, 32], sizes = [8, 32], strides = [1, 1]} : vector<8x128xf32> to vector<8x32xf32>
    %70 = arith.mulf %69, %52 : vector<8x32xf32>
    %71 = vector.extract_strided_slice %67 {offsets = [0, 0], sizes = [8, 32], strides = [1, 1]} : vector<8x128xf32> to vector<8x32xf32>
    %72 = vector.extract_strided_slice %68 {offsets = [0, 64], sizes = [8, 32], strides = [1, 1]} : vector<8x128xf32> to vector<8x32xf32>
    %73 = arith.mulf %71, %72 : vector<8x32xf32>
    %74 = arith.addf %70, %73 : vector<8x32xf32>
    %75 = vector.extract_strided_slice %67 {offsets = [0, 96], sizes = [8, 32], strides = [1, 1]} : vector<8x128xf32> to vector<8x32xf32>
    %76 = math.tanh %74 : vector<8x32xf32>
    %77 = arith.mulf %75, %76 : vector<8x32xf32>
    %c3_i32 = arith.constant 3 : i32
    %c8_i32_22 = arith.constant 8 : i32
    %78 = arith.muli %c3_i32, %c8_i32_22 : i32
    %79 = tpu.assume_multiple %78, 8 : i32
    %80 = arith.index_cast %79 : i32 to index
    %c0_23 = arith.constant 0 : index
    %81 = vector.load %arg8[%80, %c0_23] : memref<64x128xf32, #tpu.memory_space<vmem>>, vector<8x128xf32>
    %82 = arith.truncf %77 : vector<8x32xf32> to vector<8x32xbf16>
    %cst_24 = arith.constant dense<0.000000e+00> : vector<8x128xf32>
    %83 = tpu.matmul %82, %10, %cst_24 {dimension_numbers = #tpu.dot_dimension_numbers<[1], [0], [0], [1], [0, 0, 1, 1], [], []>} : vector<8x32xbf16>, vector<32x128xbf16>, vector<8x128xf32> -> vector<8x128xf32>
    %84 = arith.addf %81, %83 : vector<8x128xf32>
    %85 = arith.negf %84 : vector<8x128xf32>
    %86 = math.exp %85 : vector<8x128xf32>
    %cst_25 = arith.constant 1.000000e+00 : f32
    %87 = vector.broadcast %cst_25 : f32 to vector<8x128xf32>
    %88 = arith.addf %87, %86 : vector<8x128xf32>
    %89 = arith.divf %87, %88 : vector<8x128xf32>
    %90 = math.tanh %84 : vector<8x128xf32>
    %91 = vector.extract_strided_slice %89 {offsets = [0, 32], sizes = [8, 32], strides = [1, 1]} : vector<8x128xf32> to vector<8x32xf32>
    %92 = arith.mulf %91, %74 : vector<8x32xf32>
    %93 = vector.extract_strided_slice %89 {offsets = [0, 0], sizes = [8, 32], strides = [1, 1]} : vector<8x128xf32> to vector<8x32xf32>
    %94 = vector.extract_strided_slice %90 {offsets = [0, 64], sizes = [8, 32], strides = [1, 1]} : vector<8x128xf32> to vector<8x32xf32>
    %95 = arith.mulf %93, %94 : vector<8x32xf32>
    %96 = arith.addf %92, %95 : vector<8x32xf32>
    %97 = vector.extract_strided_slice %89 {offsets = [0, 96], sizes = [8, 32], strides = [1, 1]} : vector<8x128xf32> to vector<8x32xf32>
    %98 = math.tanh %96 : vector<8x32xf32>
    %99 = arith.mulf %97, %98 : vector<8x32xf32>
    %c4_i32 = arith.constant 4 : i32
    %c8_i32_26 = arith.constant 8 : i32
    %100 = arith.muli %c4_i32, %c8_i32_26 : i32
    %101 = tpu.assume_multiple %100, 8 : i32
    %102 = arith.index_cast %101 : i32 to index
    %c0_27 = arith.constant 0 : index
    %103 = vector.load %arg8[%102, %c0_27] : memref<64x128xf32, #tpu.memory_space<vmem>>, vector<8x128xf32>
    %104 = arith.truncf %99 : vector<8x32xf32> to vector<8x32xbf16>
    %cst_28 = arith.constant dense<0.000000e+00> : vector<8x128xf32>
    %105 = tpu.matmul %104, %10, %cst_28 {dimension_numbers = #tpu.dot_dimension_numbers<[1], [0], [0], [1], [0, 0, 1, 1], [], []>} : vector<8x32xbf16>, vector<32x128xbf16>, vector<8x128xf32> -> vector<8x128xf32>
    %106 = arith.addf %103, %105 : vector<8x128xf32>
    %107 = arith.negf %106 : vector<8x128xf32>
    %108 = math.exp %107 : vector<8x128xf32>
    %cst_29 = arith.constant 1.000000e+00 : f32
    %109 = vector.broadcast %cst_29 : f32 to vector<8x128xf32>
    %110 = arith.addf %109, %108 : vector<8x128xf32>
    %111 = arith.divf %109, %110 : vector<8x128xf32>
    %112 = math.tanh %106 : vector<8x128xf32>
    %113 = vector.extract_strided_slice %111 {offsets = [0, 32], sizes = [8, 32], strides = [1, 1]} : vector<8x128xf32> to vector<8x32xf32>
    %114 = arith.mulf %113, %96 : vector<8x32xf32>
    %115 = vector.extract_strided_slice %111 {offsets = [0, 0], sizes = [8, 32], strides = [1, 1]} : vector<8x128xf32> to vector<8x32xf32>
    %116 = vector.extract_strided_slice %112 {offsets = [0, 64], sizes = [8, 32], strides = [1, 1]} : vector<8x128xf32> to vector<8x32xf32>
    %117 = arith.mulf %115, %116 : vector<8x32xf32>
    %118 = arith.addf %114, %117 : vector<8x32xf32>
    %119 = vector.extract_strided_slice %111 {offsets = [0, 96], sizes = [8, 32], strides = [1, 1]} : vector<8x128xf32> to vector<8x32xf32>
    %120 = math.tanh %118 : vector<8x32xf32>
    %121 = arith.mulf %119, %120 : vector<8x32xf32>
    %c5_i32 = arith.constant 5 : i32
    %c8_i32_30 = arith.constant 8 : i32
    %122 = arith.muli %c5_i32, %c8_i32_30 : i32
    %123 = tpu.assume_multiple %122, 8 : i32
    %124 = arith.index_cast %123 : i32 to index
    %c0_31 = arith.constant 0 : index
    %125 = vector.load %arg8[%124, %c0_31] : memref<64x128xf32, #tpu.memory_space<vmem>>, vector<8x128xf32>
    %126 = arith.truncf %121 : vector<8x32xf32> to vector<8x32xbf16>
    %cst_32 = arith.constant dense<0.000000e+00> : vector<8x128xf32>
    %127 = tpu.matmul %126, %10, %cst_32 {dimension_numbers = #tpu.dot_dimension_numbers<[1], [0], [0], [1], [0, 0, 1, 1], [], []>} : vector<8x32xbf16>, vector<32x128xbf16>, vector<8x128xf32> -> vector<8x128xf32>
    %128 = arith.addf %125, %127 : vector<8x128xf32>
    %129 = arith.negf %128 : vector<8x128xf32>
    %130 = math.exp %129 : vector<8x128xf32>
    %cst_33 = arith.constant 1.000000e+00 : f32
    %131 = vector.broadcast %cst_33 : f32 to vector<8x128xf32>
    %132 = arith.addf %131, %130 : vector<8x128xf32>
    %133 = arith.divf %131, %132 : vector<8x128xf32>
    %134 = math.tanh %128 : vector<8x128xf32>
    %135 = vector.extract_strided_slice %133 {offsets = [0, 32], sizes = [8, 32], strides = [1, 1]} : vector<8x128xf32> to vector<8x32xf32>
    %136 = arith.mulf %135, %118 : vector<8x32xf32>
    %137 = vector.extract_strided_slice %133 {offsets = [0, 0], sizes = [8, 32], strides = [1, 1]} : vector<8x128xf32> to vector<8x32xf32>
    %138 = vector.extract_strided_slice %134 {offsets = [0, 64], sizes = [8, 32], strides = [1, 1]} : vector<8x128xf32> to vector<8x32xf32>
    %139 = arith.mulf %137, %138 : vector<8x32xf32>
    %140 = arith.addf %136, %139 : vector<8x32xf32>
    %141 = vector.extract_strided_slice %133 {offsets = [0, 96], sizes = [8, 32], strides = [1, 1]} : vector<8x128xf32> to vector<8x32xf32>
    %142 = math.tanh %140 : vector<8x32xf32>
    %143 = arith.mulf %141, %142 : vector<8x32xf32>
    %c6_i32 = arith.constant 6 : i32
    %c8_i32_34 = arith.constant 8 : i32
    %144 = arith.muli %c6_i32, %c8_i32_34 : i32
    %145 = tpu.assume_multiple %144, 8 : i32
    %146 = arith.index_cast %145 : i32 to index
    %c0_35 = arith.constant 0 : index
    %147 = vector.load %arg8[%146, %c0_35] : memref<64x128xf32, #tpu.memory_space<vmem>>, vector<8x128xf32>
    %148 = arith.truncf %143 : vector<8x32xf32> to vector<8x32xbf16>
    %cst_36 = arith.constant dense<0.000000e+00> : vector<8x128xf32>
    %149 = tpu.matmul %148, %10, %cst_36 {dimension_numbers = #tpu.dot_dimension_numbers<[1], [0], [0], [1], [0, 0, 1, 1], [], []>} : vector<8x32xbf16>, vector<32x128xbf16>, vector<8x128xf32> -> vector<8x128xf32>
    %150 = arith.addf %147, %149 : vector<8x128xf32>
    %151 = arith.negf %150 : vector<8x128xf32>
    %152 = math.exp %151 : vector<8x128xf32>
    %cst_37 = arith.constant 1.000000e+00 : f32
    %153 = vector.broadcast %cst_37 : f32 to vector<8x128xf32>
    %154 = arith.addf %153, %152 : vector<8x128xf32>
    %155 = arith.divf %153, %154 : vector<8x128xf32>
    %156 = math.tanh %150 : vector<8x128xf32>
    %157 = vector.extract_strided_slice %155 {offsets = [0, 32], sizes = [8, 32], strides = [1, 1]} : vector<8x128xf32> to vector<8x32xf32>
    %158 = arith.mulf %157, %140 : vector<8x32xf32>
    %159 = vector.extract_strided_slice %155 {offsets = [0, 0], sizes = [8, 32], strides = [1, 1]} : vector<8x128xf32> to vector<8x32xf32>
    %160 = vector.extract_strided_slice %156 {offsets = [0, 64], sizes = [8, 32], strides = [1, 1]} : vector<8x128xf32> to vector<8x32xf32>
    %161 = arith.mulf %159, %160 : vector<8x32xf32>
    %162 = arith.addf %158, %161 : vector<8x32xf32>
    %163 = vector.extract_strided_slice %155 {offsets = [0, 96], sizes = [8, 32], strides = [1, 1]} : vector<8x128xf32> to vector<8x32xf32>
    %164 = math.tanh %162 : vector<8x32xf32>
    %165 = arith.mulf %163, %164 : vector<8x32xf32>
    %c7_i32 = arith.constant 7 : i32
    %c8_i32_38 = arith.constant 8 : i32
    %166 = arith.muli %c7_i32, %c8_i32_38 : i32
    %167 = tpu.assume_multiple %166, 8 : i32
    %168 = arith.index_cast %167 : i32 to index
    %c0_39 = arith.constant 0 : index
    %169 = vector.load %arg8[%168, %c0_39] : memref<64x128xf32, #tpu.memory_space<vmem>>, vector<8x128xf32>
    %170 = arith.truncf %165 : vector<8x32xf32> to vector<8x32xbf16>
    %cst_40 = arith.constant dense<0.000000e+00> : vector<8x128xf32>
    %171 = tpu.matmul %170, %10, %cst_40 {dimension_numbers = #tpu.dot_dimension_numbers<[1], [0], [0], [1], [0, 0, 1, 1], [], []>} : vector<8x32xbf16>, vector<32x128xbf16>, vector<8x128xf32> -> vector<8x128xf32>
    %172 = arith.addf %169, %171 : vector<8x128xf32>
    %173 = arith.negf %172 : vector<8x128xf32>
    %174 = math.exp %173 : vector<8x128xf32>
    %cst_41 = arith.constant 1.000000e+00 : f32
    %175 = vector.broadcast %cst_41 : f32 to vector<8x128xf32>
    %176 = arith.addf %175, %174 : vector<8x128xf32>
    %177 = arith.divf %175, %176 : vector<8x128xf32>
    %178 = math.tanh %172 : vector<8x128xf32>
    %179 = vector.extract_strided_slice %177 {offsets = [0, 32], sizes = [8, 32], strides = [1, 1]} : vector<8x128xf32> to vector<8x32xf32>
    %180 = arith.mulf %179, %162 : vector<8x32xf32>
    %181 = vector.extract_strided_slice %177 {offsets = [0, 0], sizes = [8, 32], strides = [1, 1]} : vector<8x128xf32> to vector<8x32xf32>
    %182 = vector.extract_strided_slice %178 {offsets = [0, 64], sizes = [8, 32], strides = [1, 1]} : vector<8x128xf32> to vector<8x32xf32>
    %183 = arith.mulf %181, %182 : vector<8x32xf32>
    %184 = arith.addf %180, %183 : vector<8x32xf32>
    %185 = vector.extract_strided_slice %177 {offsets = [0, 96], sizes = [8, 32], strides = [1, 1]} : vector<8x128xf32> to vector<8x32xf32>
    %186 = math.tanh %184 : vector<8x32xf32>
    %187 = arith.mulf %185, %186 : vector<8x32xf32>
    %c8_i32_42 = arith.constant 8 : i32
    %188 = arith.negf %9 : vector<8x128xf32>
    %189 = math.exp %188 : vector<8x128xf32>
    %cst_43 = arith.constant 1.000000e+00 : f32
    %190 = vector.broadcast %cst_43 : f32 to vector<8x128xf32>
    %191 = arith.addf %190, %189 : vector<8x128xf32>
    %192 = arith.divf %190, %191 : vector<8x128xf32>
    %193 = math.tanh %9 : vector<8x128xf32>
    %194 = vector.extract_strided_slice %192 {offsets = [0, 0], sizes = [8, 32], strides = [1, 1]} : vector<8x128xf32> to vector<8x32xf32>
    %195 = vector.extract_strided_slice %193 {offsets = [0, 64], sizes = [8, 32], strides = [1, 1]} : vector<8x128xf32> to vector<8x32xf32>
    %196 = arith.mulf %194, %195 : vector<8x32xf32>
    %197 = vector.extract_strided_slice %192 {offsets = [0, 96], sizes = [8, 32], strides = [1, 1]} : vector<8x128xf32> to vector<8x32xf32>
    %198 = math.tanh %196 : vector<8x32xf32>
    %199 = arith.mulf %197, %198 : vector<8x32xf32>
    %c0_44 = arith.constant 0 : index
    %c0_45 = arith.constant 0 : index
    %200 = vector.load %arg5[%c0_44, %c0_45] : memref<64x128xbf16, #tpu.memory_space<vmem>>, vector<64x128xbf16>
    %201 = arith.truncf %187 : vector<8x32xf32> to vector<8x32xbf16>
    %202 = vector.extract_strided_slice %200 {offsets = [0, 0], sizes = [32, 128], strides = [1, 1]} : vector<64x128xbf16> to vector<32x128xbf16>
    %cst_46 = arith.constant dense<0.000000e+00> : vector<8x128xf32>
    %203 = tpu.matmul %201, %202, %cst_46 {dimension_numbers = #tpu.dot_dimension_numbers<[1], [0], [0], [1], [0, 0, 1, 1], [], []>} : vector<8x32xbf16>, vector<32x128xbf16>, vector<8x128xf32> -> vector<8x128xf32>
    %204 = arith.truncf %199 : vector<8x32xf32> to vector<8x32xbf16>
    %205 = vector.extract_strided_slice %200 {offsets = [32, 0], sizes = [32, 128], strides = [1, 1]} : vector<64x128xbf16> to vector<32x128xbf16>
    %cst_47 = arith.constant dense<0.000000e+00> : vector<8x128xf32>
    %206 = tpu.matmul %204, %205, %cst_47 {dimension_numbers = #tpu.dot_dimension_numbers<[1], [0], [0], [1], [0, 0, 1, 1], [], []>} : vector<8x32xbf16>, vector<32x128xbf16>, vector<8x128xf32> -> vector<8x128xf32>
    %207 = arith.addf %203, %206 : vector<8x128xf32>
    %c0_48 = arith.constant 0 : index
    %c0_49 = arith.constant 0 : index
    %208 = vector.load %arg6[%c0_48, %c0_49] : memref<1x128xf32, #tpu.memory_space<vmem>>, vector<1x128xf32>
    %209 = vector.broadcast %208 : vector<1x128xf32> to vector<8x128xf32>
    %210 = arith.addf %207, %209 : vector<8x128xf32>
    %c0_50 = arith.constant 0 : index
    %c0_51 = arith.constant 0 : index
    %211 = vector.load %arg7[%c0_50, %c0_51] : memref<8x128xf32, #tpu.memory_space<vmem>>, vector<8x128xf32>
    tpu.vector_store %arg7[%c0_50, %c0_51], %210 {strides = array<i32>} : memref<8x128xf32, #tpu.memory_space<vmem>>, vector<8x128xf32>,
    return
  }
  func.func @transform_0(%arg0: i32) -> (i32, i32, i32) {
    %c0_i32 = arith.constant 0 : i32
    %c0_i32_0 = arith.constant 0 : i32
    %c0_i32_1 = arith.constant 0 : i32
    return %arg0, %c0_i32, %c0_i32_0 : i32, i32, i32
  }
  func.func @transform_1(%arg0: i32) -> (i32, i32) {
    %c0_i32 = arith.constant 0 : i32
    %c0_i32_0 = arith.constant 0 : i32
    %c0_i32_1 = arith.constant 0 : i32
    return %c0_i32, %c0_i32_0 : i32, i32
  }
  func.func @transform_2(%arg0: i32) -> (i32, i32) {
    %c0_i32 = arith.constant 0 : i32
    %c0_i32_0 = arith.constant 0 : i32
    %c0_i32_1 = arith.constant 0 : i32
    return %c0_i32, %c0_i32_0 : i32, i32
  }
  func.func @transform_3(%arg0: i32) -> (i32, i32) {
    %c0_i32 = arith.constant 0 : i32
    %c0_i32_0 = arith.constant 0 : i32
    %c0_i32_1 = arith.constant 0 : i32
    return %c0_i32, %c0_i32_0 : i32, i32
  }
  func.func @transform_4(%arg0: i32) -> (i32, i32) {
    %c0_i32 = arith.constant 0 : i32
    %c0_i32_0 = arith.constant 0 : i32
    %c0_i32_1 = arith.constant 0 : i32
    return %c0_i32, %c0_i32_0 : i32, i32
  }
  func.func @transform_5(%arg0: i32) -> (i32, i32) {
    %c0_i32 = arith.constant 0 : i32
    %c0_i32_0 = arith.constant 0 : i32
    %c0_i32_1 = arith.constant 0 : i32
    return %c0_i32, %c0_i32_0 : i32, i32
  }
  func.func @transform_6(%arg0: i32) -> (i32, i32) {
    %c0_i32 = arith.constant 0 : i32
    %c0_i32_0 = arith.constant 0 : i32
    return %arg0, %c0_i32 : i32, i32
  }
}

</mosaic_0001>

<bundles_post_ra>
// kernel: tpu_custom_call.1
= control target key start
LH: loop header
LB: loop body
LE: loop exit
PB: predicated region body
PF: predicated region fallthrough
CT: control target
= control target key end

     0   :  { %11 = vsyncpa [#allocation4], 0  ;;  %s1482_s0 = inlined_call_operand.vmem [shape: bf16[1,64,16], index: 0, kind: input, shape index: {}]   ;;  %s1483_s1 = inlined_call_operand.vmem [shape: bf16[16,256], index: 1, kind: input, shape index: {}]   ;;  %s1484_s2 = inlined_call_operand.hbm [shape: bf16[32,128], index: 2, kind: input, shape index: {}]   ;;  %s1485_s3 = inlined_call_operand.vmem [shape: f32[1,256], index: 3, kind: input, shape index: {}]   ;;  %s1486_s4 = inlined_call_operand.vmem [shape: bf16[64,128], index: 4, kind: input, shape index: {}]   ;;  %s1487_s5 = inlined_call_operand.vmem [shape: f32[1,128], index: 5, kind: input, shape index: {}]   ;;  %s1488_s6 = inlined_call_operand.hbm [shape: f32[8,128], index: 6, kind: output, shape index: {}]  }
   0x1   :  { %12 = vsyncpa [#allocation5], 0  ;;  %s1237_s21 = smov [#allocation3]   ;;  %s1189_s25 = scalar_lea.hbm %s1484_s2, 256 }
   0x2   :  { %s22_s22 = sshll.u32 %s1237_s21, 4  ;;  %p1190_p0 = scmp.ne.s32.totalorder %s1484_s2, %s1189_s25  ;;  %s23_s22 = int_to_ptr.vmem [resolvable:$true] %s22_s22 }
   0x3   :  { %p1193_p1 = scmp.lt.u32.totalorder %s1189_s25, %s1484_s2 }
   0x5   :  { %p1195_p2 = pnand %p1193_p1, %p1190_p0 }
   0x7   :  { %1198 = shalt.err (!%p1195_p2)
}
   0x8   :  { %s1199_s30 = scalar_lea.vmem %s23_s22, 256  ;;  %p1204_p4 = scmp.lt.s32.totalorder %s23_s22, %s23_s22 }
   0x9   :  { %p1200_p3 = scmp.ne.s32.totalorder %s23_s22, %s1199_s30  ;;  %p1205_p5 = scmp.lt.s32.totalorder %s1199_s30, %s1199_s30 }
   0xb   :  { %p1206_p6 = por %p1205_p5, %p1204_p4 }
   0xd   :  { %p1207_p7 = pnand %p1206_p6, %p1200_p3 }
   0xf   :  { %1210 = shalt.err (!%p1207_p7)
}
  0x10   :  { %s1238_s7 = smov 64   ;;  %s1239_s8 = smov 4  }
  0x11   :  { %28 = dma.hbm_to_vmem [thread:$0]  %s1484_s2, 256, %s23_s22, [#allocation4], %s1238_s7, %s1238_s7, %s1239_s8  }
  0x12   :  { %1233 = dma.done.wait [#allocation4], 256  }
  0x13   :  { %1234 = vsyncadd [#allocation4], 4294967040  ;;  %v1240_v0 = vmov 0.0   ;;  %v1241_v1 = vmov 0   ;;  %vm1242_vm0 = vmmov 0   ;;  %v1302_v3 = vld [vmem:[#allocation3] sm:$0xff]   ;;  %v51_v7 = vlaneseq }
  0x14   :  { %1015 = vmatprep.subr.bf16.mxu1 %v1240_v0  ;;  %136 = vmatprep.mubr.bf16.mxu0 %v1241_v1  ;;  %v1104_v2 = vld [vmem:[%s1483_s1 + $0x4] ss:$8 sps:$4 sm:$0xff]   ;;  %v1107_v4 = vld [vmem:[%s1483_s1] ss:$8 sps:$4 sm:$0xff]   ;;  %vm91_vm1 = vcmask 130048   ;;  %vm195_vm2 = vcmask 261120  }
  0x15   :  { %1019 = vmatprep.mubr.msk.bf16.mxu1 %vm1242_vm0, %v1240_v0  ;;  %104 = vmatprep.subr.bf16.mxu0 %v1104_v2  ;;  %v1108_v5 = vld [vmem:[%s1482_s0] sm:$0xff]   ;;  %v1312_v6 = vld [vmem:[#allocation3 + $0x8] sm:$0xff]   ;;  %v1330_v8 = vshrl.u32 %v51_v7, 7  ;;  %s1244_s24 = smov 96   ;;  %s1245_s8 = smov [#allocation6]  }
  0x16   :  { %1016 = vmatpush3.bf16.msra.mxu1 %v1302_v3  ;;  %105 = vmatpush1.bf16.msra.mxu0 %v1107_v4  ;;  %v1336_v10 = vld [vmem:[%s1485_s3] sm:$0x3]  ;;  %s1243_s3 = smov 32   ;;  %v1110_v53 = vld [vmem:[%s1482_s0 + $0x8] sm:$0xff]   ;;  %s941_s9 = sshll.u32 %s1245_s8, 4  ;;  %s942_s9 = int_to_ptr.vmem [resolvable:$true] %s941_s9 }
  0x17   :  { %1017 = vmatprep.subr.bf16.mxu1 %v1240_v0  ;;  %1047 = vmatprep.subr.bf16.mxu0 %v1240_v0  ;;  %v53_v9 = vsub.s32 0, %v1330_v8  ;;  %s1211_s10 = scalar_lea.vmem %s942_s9, 128  ;;  %p1216_p9 = scmp.lt.s32.totalorder %s942_s9, %s942_s9 }
  0x18   :  { %p1212_p8 = scmp.ne.s32.totalorder %s942_s9, %s1211_s10  ;;  %p1217_p10 = scmp.lt.s32.totalorder %s1211_s10, %s1211_s10 }
  0x19   :  { %956 = vmatmul.mubr.msk.bf16.vlgmr.msra.gmra.mrb[0].mxu0 %vm91_vm1, %v1108_v5  ;;  %v1339_v11 = vrot.slane %v1336_v10, %v53_v9 }
  0x1a   :  { %1018 = vmatpush3.bf16.msra.mxu1 %v1312_v6  ;;  %144 = vmatprep.mubr.bf16.mxu0 %v1241_v1  ;;  %p1218_p11 = por %p1217_p10, %p1216_p9 }
  0x1b   :  { %1023 = vmatprep.subr.bf16.mxu1 %v1240_v0  ;;  %1048 = vmatpush3.bf16.msra.mxu0 %v1302_v3 }
  0x1c   :  { %1049 = vmatprep.subr.bf16.mxu0 %v1240_v0  ;;  %p1219_p12 = pnand %p1218_p11, %p1212_p8 }
  0x1d   :  { %1020 = vmatmul.mubr.bf16.vlgmr.msra.gmra.mrb[0].mxu1 %v1241_v1 }
  0x1e   :  { %1024 = vmatpush3.bf16.msra.mxu1 %v1302_v3  ;;  %1027 = vmatprep.mubr.msk.bf16.mxu1 %vm1242_vm0, %v1240_v0 }
  0x1f   :  { %1025 = vmatprep.subr.bf16.mxu1 %v1240_v0  ;;  %1050 = vmatpush3.bf16.msra.mxu0 %v1312_v6 }
  0x20   :  { %1063 = vmatprep.subr.bf16.mxu0 %v1240_v0 }
  0x21   :  { %957 = vmatmul.mubr.msk.bf16.gmra.mrb[4].mxu0 %vm91_vm1, %v1110_v53 }
  0x22   :  { %1026 = vmatpush3.bf16.msra.mxu1 %v1312_v6  ;;  %152 = vmatprep.mubr.bf16.mxu0 %v1241_v1 }
  0x23   :  { %1031 = vmatprep.subr.bf16.mxu1 %v1240_v0 }
  0xec   :  { %v138_v12 = vpop.f32.mrb[0].mxu0 }
  0xed   :  { %v139_v13 = vadd.f32 %v138_v12, %v1339_v11  ;;  %v140_v14 = vpop.f32.mrb[1].mxu0 }
  0xee   :  { %v141_v15 = vpop.f32.mrb[2].mxu0 }
  0xef   :  { %v143_v16 = vpop.f32.mrb[3].mxu0  ;;  %v142_v37 = vadd.f32 %v141_v15, %v1339_v11 }
  0xf0   :  { %v233_v17 = vpop.f32.mrb[0].mxu1 }
  0xf1   :  { %v239_v18 = vadd.f32 %v233_v17, %v139_v13  ;;  %v1021_v19 = vpop.f32.mrb[1].mxu1 }
  0xf2   :  { %v236_v20 = vpop.f32.mrb[2].mxu1 }
  0xf3   :  { %v1022_v21 = vpop.f32.mrb[3].mxu1  ;;  %1117 = vtanh.f32 %v239_v18  ;;  %v962_v23 = vmul.f32 -1.442695, %v239_v18 }
  0xf4   :  { %v146_v58 = vpop.f32.mrb[4].mxu0 }
  0xf5   :  { %1119 = vpow2.f32 %v962_v23  ;;  %v148_v59 = vpop.f32.mrb[5].mxu0  ;;  %v147_v63 = vadd.f32 %v146_v58, %v1339_v11 }
  0xf6   :  { %v149_v60 = vpop.f32.mrb[6].mxu0 }
  0xf7   :  { %v151_v61 = vpop.f32.mrb[7].mxu0 }
  0xfd   :  { %v1118_v22 = vpop.eup %1117 }
  0xfe   :  { %249 = vrot.lane.b32.xlu0 %v1118_v22, %s1238_s7 }
  0xff   :  { %v1120_v24 = vpop.eup %1119 }
 0x100   :  { %v243_v25 = vadd.f32 1.0, %v1120_v24 }
 0x102   :  { %1121 = vrcp.f32 %v243_v25 }
 0x10c   :  { %v1122_v26 = vpop.eup %1121 }
 0x10d   :  { %v247_v29 = vmul.f32 0.0, %v1122_v26 }
 0x170   :  { %v250_v27 = vpop.permute.xlu0 %249 }
 0x171   :  { %v252_v28 = vmul.f32 %v1122_v26, %v250_v27  ;;  %v150_v27 = vadd.f32 %v149_v60, %v1339_v11 }
 0x173   :  { %254 = vrot.lane.b32.xlu0 %v252_v28, %s1243_s3 }
 0x1e5   :  { %v255_v30 = vpop.permute.xlu0 %254 }
 0x1e6   :  { %v257_v31 = vadd.f32 %v255_v30, %v247_v29 }
 0x1e8   :  { %1123 = vtanh.f32 %v257_v31 }
 0x1f2   :  { %v1124_v32 = vpop.eup %1123 }
 0x1f3   :  { %260 = vrot.lane.b32.xlu1 %v1124_v32, %s1238_s7 }
 0x265   :  { %v261_v33 = vpop.permute.xlu1 %260 }
 0x266   :  { %v263_v34 = vmul.f32 %v1122_v26, %v261_v33 }
 0x268   :  { %v266_v35 = vpack.c.bf16 %v263_v34, %v263_v34 }
 0x26a   :  { %268 = vrot.lane.b32.xlu1 %v266_v35, %s1243_s3 }
 0x2dc   :  { %v269_v36 = vpop.permute.xlu1 %268 }
 0x2dd   :  { %1028 = vmatmul.mubr.msk.bf16.vlgmr.msra.gmra.mrb[4].mxu1 %vm195_vm2, %v269_v36 }
 0x2de   :  { %1032 = vmatpush3.bf16.msra.mxu1 %v1302_v3  ;;  %1035 = vmatprep.mubr.msk.bf16.mxu1 %vm1242_vm0, %v1240_v0 }
 0x2df   :  { %1033 = vmatprep.subr.bf16.mxu1 %v1240_v0 }
 0x2e2   :  { %1034 = vmatpush3.bf16.msra.mxu1 %v1312_v6 }
 0x2e3   :  { %1039 = vmatprep.subr.bf16.mxu1 %v1240_v0 }
 0x3b0   :  { %v307_v38 = vpop.f32.mrb[4].mxu1 }
 0x3b1   :  { %v313_v39 = vadd.f32 %v307_v38, %v142_v37  ;;  %v1029_v40 = vpop.f32.mrb[5].mxu1 }
 0x3b2   :  { %v310_v41 = vpop.f32.mrb[6].mxu1 }
 0x3b3   :  { %1125 = vtanh.f32 %v313_v39  ;;  %v1030_v42 = vpop.f32.mrb[7].mxu1  ;;  %v964_v44 = vmul.f32 -1.442695, %v313_v39 }
 0x3b5   :  { %1127 = vpow2.f32 %v964_v44  ;;  %v1112_v44 = vld [vmem:[%s1482_s0 + $0x18] sm:$0xff]  }
 0x3bd   :  { %v1126_v43 = vpop.eup %1125 }
 0x3be   :  { %323 = vrot.lane.b32.xlu0 %v1126_v43, %s1238_s7  ;;  %v1111_v43 = vld [vmem:[%s1482_s0 + $0x10] sm:$0xff]  }
 0x3bf   :  { %v1128_v45 = vpop.eup %1127  ;;  %958 = vmatmul.mubr.msk.bf16.gmra.mrb[8].mxu0 %vm91_vm1, %v1111_v43 }
 0x3c0   :  { %v317_v46 = vadd.f32 1.0, %v1128_v45  ;;  %160 = vmatprep.mubr.bf16.mxu0 %v1241_v1 }
 0x3c2   :  { %1129 = vrcp.f32 %v317_v46 }
 0x3c7   :  { %959 = vmatmul.mubr.msk.bf16.gmra.mrb[12].mxu0 %vm91_vm1, %v1112_v44 }
 0x3c8   :  { %1051 = vmatprep.mubr.msk.bf16.mxu0 %vm1242_vm0, %v1240_v0 }
 0x3cc   :  { %v1130_v47 = vpop.eup %1129 }
 0x3cd   :  { %v321_v50 = vmul.f32 %v1130_v47, %v257_v31 }
 0x430   :  { %v324_v48 = vpop.permute.xlu0 %323 }
 0x431   :  { %v326_v49 = vmul.f32 %v1130_v47, %v324_v48 }
 0x433   :  { %328 = vrot.lane.b32.xlu1 %v326_v49, %s1243_s3 }
 0x492   :  { %v154_v49 = vpop.f32.mrb[8].mxu0 }
 0x4a5   :  { %v329_v51 = vpop.permute.xlu1 %328 }
 0x4a6   :  { %v331_v52 = vadd.f32 %v329_v51, %v321_v50  ;;  %v156_v50 = vpop.f32.mrb[9].mxu0 }
 0x4a7   :  { %v157_v1 = vpop.f32.mrb[10].mxu0 }
 0x4a8   :  { %1131 = vtanh.f32 %v331_v52  ;;  %v159_v51 = vpop.f32.mrb[11].mxu0 }
 0x4b2   :  { %v1132_v54 = vpop.eup %1131 }
 0x4b3   :  { %334 = vrot.lane.b32.xlu0 %v1132_v54, %s1238_s7 }
 0x525   :  { %v335_v55 = vpop.permute.xlu0 %334 }
 0x526   :  { %v337_v56 = vmul.f32 %v1130_v47, %v335_v55 }
 0x528   :  { %v340_v57 = vpack.c.bf16 %v337_v56, %v337_v56 }
 0x52a   :  { %342 = vrot.lane.b32.xlu1 %v340_v57, %s1243_s3  ;;  %v155_v57 = vadd.f32 %v154_v49, %v1339_v11 }
 0x59c   :  { %v343_v62 = vpop.permute.xlu1 %342 }
 0x59d   :  { %1036 = vmatmul.mubr.msk.bf16.vlgmr.msra.gmra.mrb[8].mxu1 %vm195_vm2, %v343_v62 }
 0x59e   :  { %1040 = vmatpush3.bf16.msra.mxu1 %v1302_v3  ;;  %1043 = vmatprep.mubr.msk.bf16.mxu1 %vm1242_vm0, %v1240_v0 }
 0x59f   :  { %1041 = vmatprep.subr.bf16.mxu1 %v1240_v0 }
 0x5a2   :  { %1042 = vmatpush3.bf16.msra.mxu1 %v1312_v6 }
 0x5a3   :  { %1055 = vmatprep.subr.bf16.mxu1 %v1240_v0 }
 0x670   :  { %v381_v2 = vpop.f32.mrb[8].mxu1 }
 0x671   :  { %v387_v4 = vadd.f32 %v381_v2, %v147_v63  ;;  %v1037_v5 = vpop.f32.mrb[9].mxu1 }
 0x672   :  { %v384_v7 = vpop.f32.mrb[10].mxu1 }
 0x673   :  { %1133 = vtanh.f32 %v387_v4  ;;  %v1038_v9 = vpop.f32.mrb[11].mxu1  ;;  %v966_v13 = vmul.f32 -1.442695, %v387_v4 }
 0x675   :  { %1135 = vpow2.f32 %v966_v13 }
 0x67d   :  { %v1134_v12 = vpop.eup %1133 }
 0x67e   :  { %397 = vrot.lane.b32.xlu0 %v1134_v12, %s1238_s7 }
 0x67f   :  { %v1136_v14 = vpop.eup %1135 }
 0x680   :  { %v391_v15 = vadd.f32 1.0, %v1136_v14 }
 0x682   :  { %1137 = vrcp.f32 %v391_v15 }
 0x68c   :  { %v1138_v16 = vpop.eup %1137 }
 0x68d   :  { %v395_v19 = vmul.f32 %v1138_v16, %v331_v52  ;;  %v1398_v52 = vpop.f32.mrb[12].mxu0 }
 0x68e   :  { %v164_v53 = vpop.f32.mrb[13].mxu0 }
 0x68f   :  { %v1400_v54 = vpop.f32.mrb[14].mxu0 }
 0x690   :  { %v1402_v55 = vpop.f32.mrb[15].mxu0 }
 0x6f0   :  { %v398_v17 = vpop.permute.xlu0 %397 }
 0x6f1   :  { %v400_v18 = vmul.f32 %v1138_v16, %v398_v17 }
 0x6f3   :  { %402 = vrot.lane.b32.xlu1 %v400_v18, %s1243_s3 }
 0x765   :  { %v403_v20 = vpop.permute.xlu1 %402 }
 0x766   :  { %v405_v21 = vadd.f32 %v403_v20, %v395_v19 }
 0x768   :  { %1139 = vtanh.f32 %v405_v21 }
 0x772   :  { %v1140_v22 = vpop.eup %1139 }
 0x773   :  { %408 = vrot.lane.b32.xlu0 %v1140_v22, %s1238_s7 }
 0x7e5   :  { %v409_v23 = vpop.permute.xlu0 %408 }
 0x7e6   :  { %v411_v24 = vmul.f32 %v1138_v16, %v409_v23 }
 0x7e8   :  { %v414_v25 = vpack.c.bf16 %v411_v24, %v411_v24 }
 0x7ea   :  { %416 = vrot.lane.b32.xlu1 %v414_v25, %s1243_s3 }
 0x85c   :  { %v417_v26 = vpop.permute.xlu1 %416 }
 0x85d   :  { %1044 = vmatmul.mubr.msk.bf16.vlgmr.msra.gmra.mrb[12].mxu1 %vm195_vm2, %v417_v26 }
 0x85e   :  { %1056 = vmatpush3.bf16.msra.mxu1 %v1302_v3  ;;  %1059 = vmatprep.mubr.msk.bf16.mxu1 %vm1242_vm0, %v1240_v0 }
 0x85f   :  { %1057 = vmatprep.subr.bf16.mxu1 %v1240_v0 }
 0x862   :  { %1058 = vmatpush3.bf16.msra.mxu1 %v1312_v6 }
 0x863   :  { %1071 = vmatprep.subr.bf16.mxu1 %v1240_v0 }
 0x930   :  { %v455_v28 = vpop.f32.mrb[12].mxu1 }
 0x931   :  { %v461_v29 = vadd.f32 %v455_v28, %v150_v27  ;;  %v1045_v30 = vpop.f32.mrb[13].mxu1 }
 0x932   :  { %v458_v31 = vpop.f32.mrb[14].mxu1 }
 0x933   :  { %1141 = vtanh.f32 %v461_v29  ;;  %v1046_v32 = vpop.f32.mrb[15].mxu1  ;;  %v968_v34 = vmul.f32 -1.442695, %v461_v29 }
 0x935   :  { %1143 = vpow2.f32 %v968_v34 }
 0x93d   :  { %v1142_v33 = vpop.eup %1141 }
 0x93e   :  { %471 = vrot.lane.b32.xlu0 %v1142_v33, %s1238_s7 }
 0x93f   :  { %v1144_v35 = vpop.eup %1143 }
 0x940   :  { %v465_v36 = vadd.f32 1.0, %v1144_v35 }
 0x942   :  { %1145 = vrcp.f32 %v465_v36 }
 0x94c   :  { %v1146_v37 = vpop.eup %1145 }
 0x94d   :  { %v469_v40 = vmul.f32 %v1146_v37, %v405_v21  ;;  %v158_v21 = vadd.f32 %v157_v1, %v1339_v11 }
 0x9b0   :  { %v472_v38 = vpop.permute.xlu0 %471 }
 0x9b1   :  { %v474_v39 = vmul.f32 %v1146_v37, %v472_v38 }
 0x9b3   :  { %476 = vrot.lane.b32.xlu1 %v474_v39, %s1243_s3 }
 0xa25   :  { %v477_v41 = vpop.permute.xlu1 %476 }
 0xa26   :  { %v479_v42 = vadd.f32 %v477_v41, %v469_v40  ;;  %v163_v40 = vadd.f32 %v1398_v52, %v1339_v11 }
 0xa28   :  { %1147 = vtanh.f32 %v479_v42 }
 0xa32   :  { %v1148_v45 = vpop.eup %1147 }
 0xa33   :  { %482 = vrot.lane.b32.xlu0 %v1148_v45, %s1238_s7 }
 0xaa5   :  { %v483_v46 = vpop.permute.xlu0 %482 }
 0xaa6   :  { %v485_v47 = vmul.f32 %v1146_v37, %v483_v46 }
 0xaa8   :  { %v488_v48 = vpack.c.bf16 %v485_v47, %v485_v47 }
 0xaaa   :  { %490 = vrot.lane.b32.xlu1 %v488_v48, %s1243_s3 }
 0xb1c   :  { %v491_v56 = vpop.permute.xlu1 %490 }
 0xb1d   :  { %1052 = vmatmul.mubr.msk.bf16.vlgmr.msra.gmra.mrb[16].mxu0 %vm195_vm2, %v491_v56 }
 0xb1e   :  { %1064 = vmatpush3.bf16.msra.mxu0 %v1302_v3  ;;  %1067 = vmatprep.mubr.msk.bf16.mxu0 %vm1242_vm0, %v1240_v0 }
 0xb1f   :  { %1065 = vmatprep.subr.bf16.mxu0 %v1240_v0 }
 0xb22   :  { %1066 = vmatpush3.bf16.msra.mxu0 %v1312_v6 }
 0xb23   :  { %1079 = vmatprep.subr.bf16.mxu0 %v1240_v0 }
 0xbf0   :  { %v529_v58 = vpop.f32.mrb[16].mxu0 }
 0xbf1   :  { %v535_v59 = vadd.f32 %v529_v58, %v155_v57  ;;  %v1053_v60 = vpop.f32.mrb[17].mxu0 }
 0xbf2   :  { %v532_v61 = vpop.f32.mrb[18].mxu0 }
 0xbf3   :  { %1149 = vtanh.f32 %v535_v59  ;;  %v1054_v62 = vpop.f32.mrb[19].mxu0  ;;  %v970_v2 = vmul.f32 -1.442695, %v535_v59 }
 0xbf4   :  { %v57_v62 = vsub.s32 1, %v1330_v8 }
 0xbf5   :  { %1151 = vpow2.f32 %v970_v2 }
 0xbf6   :  { %v58_v2 = vrot.slane %v1336_v10, %v57_v62 }
 0xbfd   :  { %v1150_v63 = vpop.eup %1149 }
 0xbfe   :  { %545 = vrot.lane.b32.xlu0 %v1150_v63, %s1238_s7  ;;  %v166_v63 = vadd.f32 %v1400_v54, %v1339_v11 }
 0xbff   :  { %v1152_v4 = vpop.eup %1151 }
 0xc00   :  { %v539_v5 = vadd.f32 1.0, %v1152_v4 }
 0xc02   :  { %1153 = vrcp.f32 %v539_v5 }
 0xc0c   :  { %v1154_v7 = vpop.eup %1153 }
 0xc0d   :  { %v543_v13 = vmul.f32 %v1154_v7, %v479_v42 }
 0xc70   :  { %v546_v9 = vpop.permute.xlu0 %545 }
 0xc71   :  { %v548_v12 = vmul.f32 %v1154_v7, %v546_v9 }
 0xc73   :  { %550 = vrot.lane.b32.xlu1 %v548_v12, %s1243_s3  ;;  %v168_v12 = vadd.f32 %v1402_v55, %v58_v2 }
 0xce5   :  { %v551_v14 = vpop.permute.xlu1 %550 }
 0xce6   :  { %v553_v15 = vadd.f32 %v551_v14, %v543_v13 }
 0xce8   :  { %1155 = vtanh.f32 %v553_v15 }
 0xcf2   :  { %v1156_v16 = vpop.eup %1155 }
 0xcf3   :  { %556 = vrot.lane.b32.xlu0 %v1156_v16, %s1238_s7  ;;  %v977_v16 = vmul.f32 -1.442695, %v168_v12 }
 0xd65   :  { %v557_v17 = vpop.permute.xlu0 %556 }
 0xd66   :  { %v559_v18 = vmul.f32 %v1154_v7, %v557_v17 }
 0xd68   :  { %v562_v19 = vpack.c.bf16 %v559_v18, %v559_v18 }
 0xd6a   :  { %564 = vrot.lane.b32.xlu1 %v562_v19, %s1243_s3 }
 0xddc   :  { %v565_v20 = vpop.permute.xlu1 %564 }
 0xddd   :  { %1060 = vmatmul.mubr.msk.bf16.vlgmr.msra.gmra.mrb[16].mxu1 %vm195_vm2, %v565_v20 }
 0xdde   :  { %1072 = vmatpush3.bf16.msra.mxu1 %v1302_v3  ;;  %1075 = vmatprep.mubr.msk.bf16.mxu1 %vm1242_vm0, %v1240_v0 }
 0xddf   :  { %1073 = vmatprep.subr.bf16.mxu1 %v1240_v0 }
 0xde2   :  { %1074 = vmatpush3.bf16.msra.mxu1 %v1312_v6 }
 0xde3   :  { %1087 = vmatprep.subr.bf16.mxu1 %v1240_v0 }
 0xeb0   :  { %v603_v22 = vpop.f32.mrb[16].mxu1 }
 0xeb1   :  { %v609_v23 = vadd.f32 %v603_v22, %v158_v21  ;;  %v1061_v24 = vpop.f32.mrb[17].mxu1 }
 0xeb2   :  { %v606_v25 = vpop.f32.mrb[18].mxu1 }
 0xeb3   :  { %1157 = vtanh.f32 %v609_v23  ;;  %v1062_v26 = vpop.f32.mrb[19].mxu1  ;;  %v972_v3 = vmul.f32 -1.442695, %v609_v23  ;;  %v1113_v23 = vld [vmem:[%s1486_s4 + $0x10] sm:$0xff]  }
 0xeb5   :  { %1159 = vpow2.f32 %v972_v3  ;;  %v1114_v3 = vld [vmem:[%s1486_s4 + $0x18] sm:$0xff]  }
 0xebd   :  { %v1158_v27 = vpop.eup %1157 }
 0xebe   :  { %619 = vrot.lane.b32.xlu0 %v1158_v27, %s1238_s7 }
 0xebf   :  { %v1160_v28 = vpop.eup %1159 }
 0xec0   :  { %v613_v29 = vadd.f32 1.0, %v1160_v28  ;;  %v1115_v28 = vld [vmem:[%s1486_s4] sm:$0xff]  }
 0xec2   :  { %1161 = vrcp.f32 %v613_v29  ;;  %v1116_v29 = vld [vmem:[%s1486_s4 + $0x8] sm:$0xff]  }
 0xecc   :  { %v1162_v30 = vpop.eup %1161 }
 0xecd   :  { %v617_v32 = vmul.f32 %v1162_v30, %v553_v15 }
 0xf30   :  { %v620_v6 = vpop.permute.xlu0 %619 }
 0xf31   :  { %v622_v31 = vmul.f32 %v1162_v30, %v620_v6 }
 0xf33   :  { %624 = vrot.lane.b32.xlu1 %v622_v31, %s1243_s3 }
 0xfa5   :  { %v625_v33 = vpop.permute.xlu1 %624 }
 0xfa6   :  { %v627_v34 = vadd.f32 %v625_v33, %v617_v32 }
 0xfa8   :  { %1163 = vtanh.f32 %v627_v34 }
 0xfb2   :  { %v1164_v35 = vpop.eup %1163 }
 0xfb3   :  { %630 = vrot.lane.b32.xlu0 %v1164_v35, %s1238_s7 }
0x1025   :  { %v631_v36 = vpop.permute.xlu0 %630 }
0x1026   :  { %v633_v37 = vmul.f32 %v1162_v30, %v631_v36 }
0x1028   :  { %v636_v38 = vpack.c.bf16 %v633_v37, %v633_v37 }
0x102a   :  { %638 = vrot.lane.b32.xlu1 %v636_v38, %s1243_s3 }
0x109c   :  { %v639_v39 = vpop.permute.xlu1 %638 }
0x109d   :  { %1068 = vmatmul.mubr.msk.bf16.vlgmr.msra.gmra.mrb[20].mxu0 %vm195_vm2, %v639_v39 }
0x109e   :  { %1083 = vmatprep.mubr.msk.bf16.mxu0 %vm1242_vm0, %v1240_v0  ;;  %1080 = vmatpush3.bf16.msra.mxu0 %v1113_v23 }
0x109f   :  { %1081 = vmatprep.subr.bf16.mxu0 %v1240_v0 }
0x10a2   :  { %1082 = vmatpush3.bf16.msra.mxu0 %v1114_v3 }
0x1170   :  { %v677_v41 = vpop.f32.mrb[20].mxu0 }
0x1171   :  { %v683_v42 = vadd.f32 %v677_v41, %v163_v40  ;;  %v1069_v43 = vpop.f32.mrb[21].mxu0 }
0x1172   :  { %v680_v44 = vpop.f32.mrb[22].mxu0 }
0x1173   :  { %1165 = vtanh.f32 %v683_v42  ;;  %v1070_v45 = vpop.f32.mrb[23].mxu0  ;;  %v974_v47 = vmul.f32 -1.442695, %v683_v42  ;;  %v984_v42 = vld [vmem:[%s1487_s5] ss:$0 sm:$0xff] }
0x1175   :  { %1167 = vpow2.f32 %v974_v47 }
0x117d   :  { %v1166_v46 = vpop.eup %1165 }
0x117e   :  { %693 = vrot.lane.b32.xlu0 %v1166_v46, %s1238_s7 }
0x117f   :  { %v1168_v48 = vpop.eup %1167 }
0x1180   :  { %v687_v49 = vadd.f32 1.0, %v1168_v48 }
0x1182   :  { %1169 = vrcp.f32 %v687_v49 }
0x118c   :  { %v1170_v50 = vpop.eup %1169 }
0x118d   :  { %v691_v52 = vmul.f32 %v1170_v50, %v627_v34 }
0x11f0   :  { %v694_v1 = vpop.permute.xlu0 %693 }
0x11f1   :  { %v696_v51 = vmul.f32 %v1170_v50, %v694_v1 }
0x11f3   :  { %698 = vrot.lane.b32.xlu1 %v696_v51, %s1243_s3 }
0x1265   :  { %v699_v53 = vpop.permute.xlu1 %698 }
0x1266   :  { %v701_v56 = vadd.f32 %v699_v53, %v691_v52 }
0x1268   :  { %1171 = vtanh.f32 %v701_v56 }
0x1272   :  { %v1172_v57 = vpop.eup %1171 }
0x1273   :  { %704 = vrot.lane.b32.xlu0 %v1172_v57, %s1238_s7 }
0x12e5   :  { %v705_v58 = vpop.permute.xlu0 %704 }
0x12e6   :  { %v707_v59 = vmul.f32 %v1170_v50, %v705_v58 }
0x12e8   :  { %v710_v60 = vpack.c.bf16 %v707_v59, %v707_v59 }
0x12ea   :  { %712 = vrot.lane.b32.xlu1 %v710_v60, %s1243_s3 }
0x135c   :  { %v713_v61 = vpop.permute.xlu1 %712 }
0x135d   :  { %1076 = vmatmul.mubr.msk.bf16.vlgmr.msra.gmra.mrb[20].mxu1 %vm195_vm2, %v713_v61 }
0x135e   :  { %1091 = vmatprep.mubr.msk.bf16.mxu1 %vm1242_vm0, %v1240_v0  ;;  %1088 = vmatpush3.bf16.msra.mxu1 %v1115_v28 }
0x135f   :  { %1089 = vmatprep.subr.bf16.mxu1 %v1240_v0 }
0x1362   :  { %1090 = vmatpush3.bf16.msra.mxu1 %v1116_v29 }
0x1430   :  { %v751_v4 = vpop.f32.mrb[20].mxu1 }
0x1431   :  { %v757_v5 = vadd.f32 %v751_v4, %v166_v63  ;;  %v1077_v7 = vpop.f32.mrb[21].mxu1 }
0x1432   :  { %v754_v9 = vpop.f32.mrb[22].mxu1 }
0x1433   :  { %1173 = vtanh.f32 %v757_v5  ;;  %v1078_v13 = vpop.f32.mrb[23].mxu1  ;;  %v976_v8 = vmul.f32 -1.442695, %v757_v5 }
0x1434   :  { %1175 = vtanh.f32 %v168_v12 }
0x1435   :  { %1177 = vpow2.f32 %v976_v8 }
0x1436   :  { %1179 = vpow2.f32 %v977_v16 }
0x143d   :  { %v1174_v14 = vpop.eup %1173 }
0x143e   :  { %767 = vrot.lane.b32.xlu0 %v1174_v14, %s1238_s7  ;;  %v1176_v15 = vpop.eup %1175 }
0x143f   :  { %v1178_v10 = vpop.eup %1177 }
0x1440   :  { %v761_v11 = vadd.f32 1.0, %v1178_v10  ;;  %v1180_v54 = vpop.eup %1179 }
0x1441   :  { %v785_v17 = vadd.f32 1.0, %v1180_v54 }
0x1442   :  { %790 = vrot.lane.b32.xlu0 %v1176_v15, %s1238_s7  ;;  %1181 = vrcp.f32 %v761_v11 }
0x1443   :  { %1183 = vrcp.f32 %v785_v17 }
0x144c   :  { %v1182_v55 = vpop.eup %1181 }
0x144d   :  { %v1184_v20 = vpop.eup %1183  ;;  %v765_v25 = vmul.f32 %v1182_v55, %v701_v56 }
0x14b0   :  { %v768_v18 = vpop.permute.xlu0 %767 }
0x14b1   :  { %v770_v19 = vmul.f32 %v1182_v55, %v768_v18 }
0x14b3   :  { %772 = vrot.lane.b32.xlu1 %v770_v19, %s1243_s3 }
0x14b4   :  { %v791_v21 = vpop.permute.xlu0 %790 }
0x14b5   :  { %v793_v22 = vmul.f32 %v1184_v20, %v791_v21 }
0x14b7   :  { %1185 = vtanh.f32 %v793_v22 }
0x14c1   :  { %v1186_v24 = vpop.eup %1185 }
0x14c2   :  { %796 = vrot.lane.b32.xlu0 %v1186_v24, %s1244_s24 }
0x1525   :  { %v773_v26 = vpop.permute.xlu1 %772 }
0x1526   :  { %v775_v27 = vadd.f32 %v773_v26, %v765_v25 }
0x1528   :  { %1187 = vtanh.f32 %v775_v27 }
0x1532   :  { %v1188_v30 = vpop.eup %1187 }
0x1533   :  { %778 = vrot.lane.b32.xlu1 %v1188_v30, %s1238_s7 }
0x1534   :  { %v797_v6 = vpop.permute.xlu0 %796 }
0x1535   :  { %v799_v31 = vmul.f32 %v1184_v20, %v797_v6 }
0x1537   :  { %v809_v32 = vpack.c.bf16 %v799_v31, %v799_v31 }
0x1539   :  { %811 = vrot.lane.b32.xlu1 %v809_v32, %s1243_s3 }
0x15a5   :  { %v779_v33 = vpop.permute.xlu1 %778 }
0x15a6   :  { %v781_v34 = vmul.f32 %v1182_v55, %v779_v33 }
0x15a8   :  { %v808_v35 = vpack.c.bf16 %v781_v34, %v781_v34 }
0x15aa   :  { %869 = vrot.lane.b32.xlu0 %v808_v35, %s1243_s3 }
0x15ab   :  { %v812_v36 = vpop.permute.xlu1 %811 }
0x15ac   :  { %1084 = vmatmul.mubr.msk.bf16.vlgmr.msra.gmra.mrb[24].mxu0 %vm195_vm2, %v812_v36 }
0x161c   :  { %v870_v37 = vpop.permute.xlu0 %869 }
0x161d   :  { %1092 = vmatmul.mubr.msk.bf16.vlgmr.msra.gmra.mrb[24].mxu1 %vm195_vm2, %v870_v37 }
0x167f   :  { %v862_v0 = vpop.f32.mrb[24].mxu0 }
0x1680   :  { %v1085_v38 = vpop.f32.mrb[25].mxu0 }
0x1681   :  { %v865_v39 = vpop.f32.mrb[26].mxu0 }
0x1682   :  { %v1086_v40 = vpop.f32.mrb[27].mxu0 }
0x16f0   :  { %v920_v41 = vpop.f32.mrb[24].mxu1 }
0x16f1   :  { %v921_v43 = vadd.f32 %v920_v41, %v862_v0  ;;  %v1093_v44 = vpop.f32.mrb[25].mxu1 }
0x16f2   :  { %v923_v45 = vpop.f32.mrb[26].mxu1 }
0x16f3   :  { %v933_v46 = vadd.f32 %v984_v42, %v921_v43  ;;  %v1094_v47 = vpop.f32.mrb[27].mxu1 }
0x16f5   :  { %934 = vst [vmem:[#allocation6] sm:$0xff] %v933_v46 }
0x16f6   :  { %1222 = shalt.err (!%p1219_p12)
}
0x16f7   :  { %s1223_s5 = scalar_lea.hbm %s1488_s6, 128 }
0x16f8   :  { %p1224_p13 = scmp.ne.s32.totalorder %s1488_s6, %s1223_s5  ;;  %p1227_p0 = scmp.lt.u32.totalorder %s1223_s5, %s1488_s6 }
0x16fa   :  { %p1229_p1 = pnand %p1227_p0, %p1224_p13 }
0x16fc   :  { %1232 = shalt.err (!%p1229_p1)
}
0x16fd   :  { %944 = dma.vmem_to_hbm [thread:$0]  %s942_s9, 128, %s1488_s6, [#allocation5]  }
0x16fe   :  { %1235 = dma.done.wait [#allocation5], 128  }
0x16ff   :  { %1236 = vsyncadd [#allocation5], 4294967168 }
0x1700   :  { %948 = vsyncpa [#allocation4], 1 }
0x1701   :  { %949 = vsyncpa [#allocation5], 1 }

</bundles_post_ra>
